<compile_context>
chip_gen: v6e
topology: v6e:2x2x1
jax: 0.10.0
libtpu: 0.0.40
codegen_flags: <defaults>
</compile_context>

<pallas_src>
import numpy as np
import jax
import jax.numpy as jnp
from jax.experimental import pallas as pl
from jax.experimental.pallas import tpu as pltpu

EPS = 1e-5  # TODO(synk): fla's layer_norm_fn may use eps=1e-6; F.layer_norm uses 1e-5.

_VMEM_PIPELINE_BUDGET = 32 * 1024 * 1024   # bytes for pipeline buffers (safe on v7x 64 MiB)
_VMEM_LIMIT_BYTES = 48 * 1024 * 1024       # scoped VMEM request (<= physical on v5e/v6e/v7x)


def _rebased_kernel(x_ref, gamma_ref, beta_ref, sa_ref, sb_ref, o_ref):
    # x_ref: (TM, D); gamma/beta: (1, D); sa/sb: (D, M); o: (TM, M)
    x = x_ref[...].astype(jnp.float32)
    mean = jnp.mean(x, axis=-1, keepdims=True)
    xc = x - mean
    var = jnp.mean(xc * xc, axis=-1, keepdims=True)
    y = xc * jax.lax.rsqrt(var + EPS)
    y = y * gamma_ref[...].astype(jnp.float32) + beta_ref[...].astype(jnp.float32)
    # Select y[a_k] (one-hot) and scale_k * y[b_k] (scaled one-hot) per output
    # column via MXU matmuls; the per-column scale is baked into sel_b.
    ya = jnp.dot(y, sa_ref[...], preferred_element_type=jnp.float32)
    yb = jnp.dot(y, sb_ref[...], preferred_element_type=jnp.float32)
    o_ref[...] = (ya * yb).astype(o_ref.dtype)


def _build_selection(head_dim: int):
    """One-hot selection matrices for the rebased feature map (scale folded into sel_b)."""
    D = head_dim
    # diagonal part first (scaled by D**-0.5), then strict upper triangle in
    # torch.triu_indices row-major order (scaled by sqrt(2/D)).
    a_idx = list(range(D))
    b_idx = list(range(D))
    scales = [D ** -0.5] * D
    off_scale = (2.0 / D) ** 0.5
    for i in range(D):
        for j in range(i + 1, D):
            a_idx.append(i)
            b_idx.append(j)
            scales.append(off_scale)
    M = len(a_idx)
    sel_a = np.zeros((D, M), dtype=np.float32)
    sel_b = np.zeros((D, M), dtype=np.float32)
    sel_a[np.array(a_idx), np.arange(M)] = 1.0
    sel_b[np.array(b_idx), np.arange(M)] = np.asarray(scales, dtype=np.float32)
    # TODO(synk): for D >= 32, padding M to a multiple of 128 with zero columns would
    # give unmasked lane-dense stores, but changes the output width vs. the torch spec.
    return jnp.asarray(sel_a), jnp.asarray(sel_b), M


def _cap_tile_rows_for_vmem(tile_rows: int, D: int, M: int, in_bytes: int, out_bytes: int) -> int:
    """Shrink the requested row tile until double-buffered x/out tiles fit the VMEM budget."""
    const_bytes = 2 * D * M * 4 + 2 * D * 4  # sel_a, sel_b, gamma, beta (single-buffered)

    def usage(tm):
        return 2 * tm * D * in_bytes + 2 * tm * M * out_bytes + const_bytes

    tm = max(8, (tile_rows // 8) * 8)
    while tm > 8 and usage(tm) > _VMEM_PIPELINE_BUDGET:
        tm = max(8, ((tm // 2) // 8) * 8)
    return tm


def _choose_tile(N: int, tile_rows: int):
    """Prefer TM that is a multiple of 8 AND divides N, so no pad / out[:N] copy."""
    cap = min(tile_rows, N)
    start = cap - (cap % 8)
    for d in range(start, 7, -8):
        if N % d == 0:
            return d, N
    TM = min(tile_rows, max(8, ((N + 7) // 8) * 8))
    N_pad = ((N + TM - 1) // TM) * TM
    return TM, N_pad


def _build_call(TM: int, N_pad: int, D: int, M: int, out_dtype, single_buffer_consts: bool):
    const_kw = {"pipeline_mode": pl.Buffered(1)} if single_buffer_consts else {}
    grid = (N_pad // TM,)
    return pl.pallas_call(
        _rebased_kernel,
        out_shape=jax.ShapeDtypeStruct((N_pad, M), out_dtype),
        grid_spec=pltpu.PrefetchScalarGridSpec(
            num_scalar_prefetch=0,
            grid=grid,
            in_specs=[
                pl.BlockSpec((TM, D), lambda i: (i, 0)),              # x rows (pipelined)
                pl.BlockSpec((1, D), lambda i: (0, 0), **const_kw),   # gamma (grid-invariant)
                pl.BlockSpec((1, D), lambda i: (0, 0), **const_kw),   # beta
                pl.BlockSpec((D, M), lambda i: (0, 0), **const_kw),   # sel_a
                pl.BlockSpec((D, M), lambda i: (0, 0), **const_kw),   # sel_b (scales folded in)
            ],
            out_specs=pl.BlockSpec((TM, M), lambda i: (i, 0)),
        ),
        compiler_params=pltpu.CompilerParams(
            dimension_semantics=("parallel",),
            vmem_limit_bytes=_VMEM_LIMIT_BYTES,
        ),
    )


def rebased_feature_map(x, gamma, beta, *, tile_rows: int = 1024):
    """x: [B, H, T, D] -> [B, H, T, D + D*(D-1)//2], same dtype as x."""
    B, H, T, D = x.shape
    sel_a, sel_b, M = _build_selection(D)

    N = B * H * T
    out_dtype = x.dtype
    in_bytes = np.dtype(x.dtype).itemsize
    out_bytes = np.dtype(out_dtype).itemsize

    tile_rows = _cap_tile_rows_for_vmem(tile_rows, D, M, in_bytes, out_bytes)
    TM, N_pad = _choose_tile(N, tile_rows)

    x2d = x.reshape(N, D)
    if N_pad != N:  # only when no divisor tile exists; avoided in the common case
        x2d = jnp.pad(x2d, ((0, N_pad - N), (0, 0)))

    gamma2d = gamma.reshape(1, D).astype(jnp.float32)
    beta2d = beta.reshape(1, D).astype(jnp.float32)

    args = (x2d, gamma2d, beta2d, sel_a, sel_b)
    try:
        out2d = _build_call(TM, N_pad, D, M, out_dtype, True)(*args)
    except Exception:
        # Fallback if this Pallas/Mosaic version rejects pl.Buffered(1) single-buffering.
        out2d = _build_call(TM, N_pad, D, M, out_dtype, False)(*args)

    if N_pad != N:
        out2d = out2d[:N]
    return out2d.reshape(B, H, T, M)


def _reference(x, gamma, beta):
    """Pure-JAX reference mirroring the PyTorch module."""
    D = x.shape[-1]
    mean = jnp.mean(x, axis=-1, keepdims=True)
    var = jnp.mean((x - mean) ** 2, axis=-1, keepdims=True)
    y = (x - mean) / jnp.sqrt(var + EPS) * gamma + beta
    z = jnp.einsum("...i,...j->...ij", y, y)
    iu, ju = np.triu_indices(D, k=1)
    offdiag = z[..., iu, ju]
    diag = z[..., np.arange(D), np.arange(D)]
    return jnp.concatenate(
        [diag * D ** -0.5, offdiag * (2.0 / D) ** 0.5], axis=-1
    )


if __name__ == "__main__":
    key = jax.random.PRNGKey(0)
    B, H, T, D = 2, 4, 8, 16
    x = jax.random.normal(key, (B, H, T, D), dtype=jnp.float32)

    # deterministic parameter init, matching nn.Parameter(torch.ones/zeros(head_dim))
    gamma = jnp.ones((D,), dtype=jnp.float32)
    beta = jnp.zeros((D,), dtype=jnp.float32)

    out = rebased_feature_map(x, gamma, beta)
    out = jax.block_until_ready(out)

    ref = _reference(x, gamma, beta)
    assert out.shape == (B, H, T, D + D * (D - 1) // 2)
    np.testing.assert_allclose(np.asarray(out), np.asarray(ref), rtol=1e-5, atol=1e-5)

    print("KERNEL_OK")
</pallas_src>

<mosaic_0001>
module attributes {stable_mosaic.version = 11 : i64} {
  func.func @_rebased_kernel(%arg0: i32, %arg1: memref<64x16xf32, #tpu.memory_space<vmem>>, %arg2: memref<1x16xf32, #tpu.memory_space<vmem>>, %arg3: memref<1x16xf32, #tpu.memory_space<vmem>>, %arg4: memref<16x136xf32, #tpu.memory_space<vmem>>, %arg5: memref<16x136xf32, #tpu.memory_space<vmem>>, %arg6: memref<64x136xf32, #tpu.memory_space<vmem>>) attributes {dimension_semantics = [#tpu.dimension_semantics<parallel>], iteration_bounds = array<i64: 1>, scalar_prefetch = 0 : i64, scratch_operands = 0 : i64, tpu.core_type = #tpu.core_type<tc>, window_params = [{transform_indices = @transform_0, window_bounds = array<i64: 64, 16>}, {pipeline_mode = #tpu.pipeline_mode<synchronous>, transform_indices = @transform_1, window_bounds = array<i64: 1, 16>}, {pipeline_mode = #tpu.pipeline_mode<synchronous>, transform_indices = @transform_2, window_bounds = array<i64: 1, 16>}, {pipeline_mode = #tpu.pipeline_mode<synchronous>, transform_indices = @transform_3, window_bounds = array<i64: 16, 136>}, {pipeline_mode = #tpu.pipeline_mode<synchronous>, transform_indices = @transform_4, window_bounds = array<i64: 16, 136>}, {transform_indices = @transform_5, window_bounds = array<i64: 64, 136>}]} {
    %c0 = arith.constant 0 : index
    %c0_0 = arith.constant 0 : index
    %0 = vector.load %arg1[%c0, %c0_0] : memref<64x16xf32, #tpu.memory_space<vmem>>, vector<64x16xf32>
    %cst = arith.constant dense<0.000000e+00> : vector<64xf32>
    %1 = vector.multi_reduction <add>, %0, %cst [1] : vector<64x16xf32> to vector<64xf32>
    %2 = vector.shape_cast %1 : vector<64xf32> to vector<64x1xf32>
    %cst_1 = arith.constant 1.600000e+01 : f32
    %3 = vector.broadcast %cst_1 : f32 to vector<64x1xf32>
    %4 = arith.divf %2, %3 : vector<64x1xf32>
    %5 = vector.broadcast %4 : vector<64x1xf32> to vector<64x16xf32>
    %6 = arith.subf %0, %5 : vector<64x16xf32>
    %7 = arith.mulf %6, %6 : vector<64x16xf32>
    %cst_2 = arith.constant dense<0.000000e+00> : vector<64xf32>
    %8 = vector.multi_reduction <add>, %7, %cst_2 [1] : vector<64x16xf32> to vector<64xf32>
    %9 = vector.shape_cast %8 : vector<64xf32> to vector<64x1xf32>
    %cst_3 = arith.constant 1.600000e+01 : f32
    %10 = vector.broadcast %cst_3 : f32 to vector<64x1xf32>
    %11 = arith.divf %9, %10 : vector<64x1xf32>
    %cst_4 = arith.constant 9.99999974E-6 : f32
    %12 = vector.broadcast %cst_4 : f32 to vector<64x1xf32>
    %13 = arith.addf %11, %12 : vector<64x1xf32>
    %14 = math.rsqrt %13 : vector<64x1xf32>
    %15 = vector.broadcast %14 : vector<64x1xf32> to vector<64x16xf32>
    %16 = arith.mulf %6, %15 : vector<64x16xf32>
    %c0_5 = arith.constant 0 : index
    %c0_6 = arith.constant 0 : index
    %17 = vector.load %arg2[%c0_5, %c0_6] : memref<1x16xf32, #tpu.memory_space<vmem>>, vector<1x16xf32>
    %18 = vector.broadcast %17 : vector<1x16xf32> to vector<64x16xf32>
    %19 = arith.mulf %16, %18 : vector<64x16xf32>
    %c0_7 = arith.constant 0 : index
    %c0_8 = arith.constant 0 : index
    %20 = vector.load %arg3[%c0_7, %c0_8] : memref<1x16xf32, #tpu.memory_space<vmem>>, vector<1x16xf32>
    %21 = vector.broadcast %20 : vector<1x16xf32> to vector<64x16xf32>
    %22 = arith.addf %19, %21 : vector<64x16xf32>
    %c0_9 = arith.constant 0 : index
    %c0_10 = arith.constant 0 : index
    %23 = vector.load %arg4[%c0_9, %c0_10] : memref<16x136xf32, #tpu.memory_space<vmem>>, vector<16x136xf32>
    %cst_11 = arith.constant dense<0.000000e+00> : vector<64x136xf32>
    %24 = tpu.matmul %22, %23, %cst_11 {dimension_numbers = #tpu.dot_dimension_numbers<[1], [0], [0], [1], [0, 0, 1, 1], [], []>} : vector<64x16xf32>, vector<16x136xf32>, vector<64x136xf32> -> vector<64x136xf32>
    %c0_12 = arith.constant 0 : index
    %c0_13 = arith.constant 0 : index
    %25 = vector.load %arg5[%c0_12, %c0_13] : memref<16x136xf32, #tpu.memory_space<vmem>>, vector<16x136xf32>
    %cst_14 = arith.constant dense<0.000000e+00> : vector<64x136xf32>
    %26 = tpu.matmul %22, %25, %cst_14 {dimension_numbers = #tpu.dot_dimension_numbers<[1], [0], [0], [1], [0, 0, 1, 1], [], []>} : vector<64x16xf32>, vector<16x136xf32>, vector<64x136xf32> -> vector<64x136xf32>
    %27 = arith.mulf %24, %26 : vector<64x136xf32>
    %c0_15 = arith.constant 0 : index
    %c0_16 = arith.constant 0 : index
    %28 = vector.load %arg6[%c0_15, %c0_16] : memref<64x136xf32, #tpu.memory_space<vmem>>, vector<64x136xf32>
    tpu.vector_store %arg6[%c0_15, %c0_16], %27 {strides = array<i32>} : memref<64x136xf32, #tpu.memory_space<vmem>>, vector<64x136xf32>,
    return
  }
  func.func @transform_0(%arg0: i32) -> (i32, i32) {
    %c0_i32 = arith.constant 0 : i32
    %c0_i32_0 = arith.constant 0 : i32
    return %arg0, %c0_i32 : i32, i32
  }
  func.func @transform_1(%arg0: i32) -> (i32, i32) {
    %c0_i32 = arith.constant 0 : i32
    %c0_i32_0 = arith.constant 0 : i32
    %c0_i32_1 = arith.constant 0 : i32
    return %c0_i32, %c0_i32_0 : i32, i32
  }
  func.func @transform_2(%arg0: i32) -> (i32, i32) {
    %c0_i32 = arith.constant 0 : i32
    %c0_i32_0 = arith.constant 0 : i32
    %c0_i32_1 = arith.constant 0 : i32
    return %c0_i32, %c0_i32_0 : i32, i32
  }
  func.func @transform_3(%arg0: i32) -> (i32, i32) {
    %c0_i32 = arith.constant 0 : i32
    %c0_i32_0 = arith.constant 0 : i32
    %c0_i32_1 = arith.constant 0 : i32
    return %c0_i32, %c0_i32_0 : i32, i32
  }
  func.func @transform_4(%arg0: i32) -> (i32, i32) {
    %c0_i32 = arith.constant 0 : i32
    %c0_i32_0 = arith.constant 0 : i32
    %c0_i32_1 = arith.constant 0 : i32
    return %c0_i32, %c0_i32_0 : i32, i32
  }
  func.func @transform_5(%arg0: i32) -> (i32, i32) {
    %c0_i32 = arith.constant 0 : i32
    %c0_i32_0 = arith.constant 0 : i32
    return %arg0, %c0_i32 : i32, i32
  }
}

module attributes {stable_mosaic.version = 11 : i64} {
  func.func @_rebased_kernel(%arg0: i32, %arg1: memref<64x16xf32, #tpu.memory_space<vmem>>, %arg2: memref<1x16xf32, #tpu.memory_space<vmem>>, %arg3: memref<1x16xf32, #tpu.memory_space<vmem>>, %arg4: memref<16x136xf32, #tpu.memory_space<vmem>>, %arg5: memref<16x136xf32, #tpu.memory_space<vmem>>, %arg6: memref<64x136xf32, #tpu.memory_space<vmem>>) attributes {dimension_semantics = [#tpu.dimension_semantics<parallel>], iteration_bounds = array<i64: 1>, scalar_prefetch = 0 : i64, scratch_operands = 0 : i64, tpu.core_type = #tpu.core_type<tc>, window_params = [{transform_indices = @transform_0, window_bounds = array<i64: 64, 16>}, {pipeline_mode = #tpu.pipeline_mode<synchronous>, transform_indices = @transform_1, window_bounds = array<i64: 1, 16>}, {pipeline_mode = #tpu.pipeline_mode<synchronous>, transform_indices = @transform_2, window_bounds = array<i64: 1, 16>}, {pipeline_mode = #tpu.pipeline_mode<synchronous>, transform_indices = @transform_3, window_bounds = array<i64: 16, 136>}, {pipeline_mode = #tpu.pipeline_mode<synchronous>, transform_indices = @transform_4, window_bounds = array<i64: 16, 136>}, {transform_indices = @transform_5, window_bounds = array<i64: 64, 136>}]} {
    %c0 = arith.constant 0 : index
    %c0_0 = arith.constant 0 : index
    %0 = vector.load %arg1[%c0, %c0_0] : memref<64x16xf32, #tpu.memory_space<vmem>>, vector<64x16xf32>
    %cst = arith.constant dense<0.000000e+00> : vector<64xf32>
    %1 = vector.multi_reduction <add>, %0, %cst [1] : vector<64x16xf32> to vector<64xf32>
    %2 = vector.shape_cast %1 : vector<64xf32> to vector<64x1xf32>
    %cst_1 = arith.constant 1.600000e+01 : f32
    %3 = vector.broadcast %cst_1 : f32 to vector<64x1xf32>
    %4 = arith.divf %2, %3 : vector<64x1xf32>
    %5 = vector.broadcast %4 : vector<64x1xf32> to vector<64x16xf32>
    %6 = arith.subf %0, %5 : vector<64x16xf32>
    %7 = arith.mulf %6, %6 : vector<64x16xf32>
    %cst_2 = arith.constant dense<0.000000e+00> : vector<64xf32>
    %8 = vector.multi_reduction <add>, %7, %cst_2 [1] : vector<64x16xf32> to vector<64xf32>
    %9 = vector.shape_cast %8 : vector<64xf32> to vector<64x1xf32>
    %cst_3 = arith.constant 1.600000e+01 : f32
    %10 = vector.broadcast %cst_3 : f32 to vector<64x1xf32>
    %11 = arith.divf %9, %10 : vector<64x1xf32>
    %cst_4 = arith.constant 9.99999974E-6 : f32
    %12 = vector.broadcast %cst_4 : f32 to vector<64x1xf32>
    %13 = arith.addf %11, %12 : vector<64x1xf32>
    %14 = math.rsqrt %13 : vector<64x1xf32>
    %15 = vector.broadcast %14 : vector<64x1xf32> to vector<64x16xf32>
    %16 = arith.mulf %6, %15 : vector<64x16xf32>
    %c0_5 = arith.constant 0 : index
    %c0_6 = arith.constant 0 : index
    %17 = vector.load %arg2[%c0_5, %c0_6] : memref<1x16xf32, #tpu.memory_space<vmem>>, vector<1x16xf32>
    %18 = vector.broadcast %17 : vector<1x16xf32> to vector<64x16xf32>
    %19 = arith.mulf %16, %18 : vector<64x16xf32>
    %c0_7 = arith.constant 0 : index
    %c0_8 = arith.constant 0 : index
    %20 = vector.load %arg3[%c0_7, %c0_8] : memref<1x16xf32, #tpu.memory_space<vmem>>, vector<1x16xf32>
    %21 = vector.broadcast %20 : vector<1x16xf32> to vector<64x16xf32>
    %22 = arith.addf %19, %21 : vector<64x16xf32>
    %c0_9 = arith.constant 0 : index
    %c0_10 = arith.constant 0 : index
    %23 = vector.load %arg4[%c0_9, %c0_10] : memref<16x136xf32, #tpu.memory_space<vmem>>, vector<16x136xf32>
    %cst_11 = arith.constant dense<0.000000e+00> : vector<64x136xf32>
    %24 = tpu.matmul %22, %23, %cst_11 {dimension_numbers = #tpu.dot_dimension_numbers<[1], [0], [0], [1], [0, 0, 1, 1], [], []>} : vector<64x16xf32>, vector<16x136xf32>, vector<64x136xf32> -> vector<64x136xf32>
    %c0_12 = arith.constant 0 : index
    %c0_13 = arith.constant 0 : index
    %25 = vector.load %arg5[%c0_12, %c0_13] : memref<16x136xf32, #tpu.memory_space<vmem>>, vector<16x136xf32>
    %cst_14 = arith.constant dense<0.000000e+00> : vector<64x136xf32>
    %26 = tpu.matmul %22, %25, %cst_14 {dimension_numbers = #tpu.dot_dimension_numbers<[1], [0], [0], [1], [0, 0, 1, 1], [], []>} : vector<64x16xf32>, vector<16x136xf32>, vector<64x136xf32> -> vector<64x136xf32>
    %27 = arith.mulf %24, %26 : vector<64x136xf32>
    %c0_15 = arith.constant 0 : index
    %c0_16 = arith.constant 0 : index
    %28 = vector.load %arg6[%c0_15, %c0_16] : memref<64x136xf32, #tpu.memory_space<vmem>>, vector<64x136xf32>
    tpu.vector_store %arg6[%c0_15, %c0_16], %27 {strides = array<i32>} : memref<64x136xf32, #tpu.memory_space<vmem>>, vector<64x136xf32>,
    return
  }
  func.func @transform_0(%arg0: i32) -> (i32, i32) {
    %c0_i32 = arith.constant 0 : i32
    %c0_i32_0 = arith.constant 0 : i32
    return %arg0, %c0_i32 : i32, i32
  }
  func.func @transform_1(%arg0: i32) -> (i32, i32) {
    %c0_i32 = arith.constant 0 : i32
    %c0_i32_0 = arith.constant 0 : i32
    %c0_i32_1 = arith.constant 0 : i32
    return %c0_i32, %c0_i32_0 : i32, i32
  }
  func.func @transform_2(%arg0: i32) -> (i32, i32) {
    %c0_i32 = arith.constant 0 : i32
    %c0_i32_0 = arith.constant 0 : i32
    %c0_i32_1 = arith.constant 0 : i32
    return %c0_i32, %c0_i32_0 : i32, i32
  }
  func.func @transform_3(%arg0: i32) -> (i32, i32) {
    %c0_i32 = arith.constant 0 : i32
    %c0_i32_0 = arith.constant 0 : i32
    %c0_i32_1 = arith.constant 0 : i32
    return %c0_i32, %c0_i32_0 : i32, i32
  }
  func.func @transform_4(%arg0: i32) -> (i32, i32) {
    %c0_i32 = arith.constant 0 : i32
    %c0_i32_0 = arith.constant 0 : i32
    %c0_i32_1 = arith.constant 0 : i32
    return %c0_i32, %c0_i32_0 : i32, i32
  }
  func.func @transform_5(%arg0: i32) -> (i32, i32) {
    %c0_i32 = arith.constant 0 : i32
    %c0_i32_0 = arith.constant 0 : i32
    return %arg0, %c0_i32 : i32, i32
  }
}

</mosaic_0001>

<bundles_post_ra>
// kernel: tpu_custom_call.1
= control target key start
LH: loop header
LB: loop body
LE: loop exit
PB: predicated region body
PF: predicated region fallthrough
CT: control target
= control target key end

     0   :  { %vm29_vm0 = vcmask 130048   ;;  %s719_s0 = inlined_call_operand.vmem [shape: f32[64,16], index: 0, kind: input, shape index: {}]   ;;  %s720_s1 = inlined_call_operand.vmem [shape: f32[1,16], index: 1, kind: input, shape index: {}]   ;;  %s721_s2 = inlined_call_operand.vmem [shape: f32[1,16], index: 2, kind: input, shape index: {}]   ;;  %s722_s3 = inlined_call_operand.vmem [shape: f32[16,136], index: 3, kind: input, shape index: {}]   ;;  %s723_s4 = inlined_call_operand.vmem [shape: f32[16,136], index: 4, kind: input, shape index: {}]   ;;  %s724_s5 = inlined_call_operand.hbm [shape: f32[64,136], index: 5, kind: output, shape index: {}]  }
   0x1   :  { %v21_v0 = vld [vmem:[%s719_s0] sm:$0xff]  ;;  %v23_v1 = vld [vmem:[%s719_s0 + $0x10] sm:$0xff]  ;;  %v22_v2 = vld [vmem:[%s719_s0 + $0x8] sm:$0xff] }
   0x2   :  { %v30_v3 = vsel %vm29_vm0, %v21_v0, 0.0  ;;  %v36_v4 = vsel %vm29_vm0, %v23_v1, 0.0  ;;  %v24_v5 = vld [vmem:[%s719_s0 + $0x18] sm:$0xff]  ;;  %v33_v6 = vsel %vm29_vm0, %v22_v2, 0.0 }
   0x3   :  { %31 = vadd.xlane.f32.xlu0 %v30_v3  ;;  %37 = vadd.xlane.f32.xlu1 %v36_v4  ;;  %v39_v7 = vsel %vm29_vm0, %v24_v5, 0.0 }
   0x4   :  { %10 = vsyncpa [#allocation3], 0  ;;  %v25_v8 = vld [vmem:[%s719_s0 + $0x20] sm:$0xff]  ;;  %v26_v9 = vld [vmem:[%s719_s0 + $0x28] sm:$0xff]  ;;  %vm440_vm1 = vcmask 64512  }
   0x5   :  { %v42_v10 = vsel %vm29_vm0, %v25_v8, 0.0  ;;  %v45_v11 = vsel %vm29_vm0, %v26_v9, 0.0  ;;  %v27_v12 = vld [vmem:[%s719_s0 + $0x30] sm:$0xff]  ;;  %v28_v13 = vld [vmem:[%s719_s0 + $0x38] sm:$0xff]  ;;  %v166_v60 = vld [vmem:[%s722_s3 + $0x8] sm:$0xff] }
   0x6   :  { %v48_v14 = vsel %vm29_vm0, %v27_v12, 0.0  ;;  %v51_v15 = vsel %vm29_vm0, %v28_v13, 0.0  ;;  %v168_v56 = vld [vmem:[%s722_s3 + $0x18] sm:$0xff]  ;;  %v167_v58 = vld [vmem:[%s722_s3 + $0x10] sm:$0xff]  ;;  %v307_v61 = vld [vmem:[%s723_s4 + $0x8] sm:$0xff] }
   0x7   :  { %34 = vadd.xlane.f32.xlu0 %v33_v6  ;;  %40 = vadd.xlane.f32.xlu1 %v39_v7  ;;  %v309_v57 = vld [vmem:[%s723_s4 + $0x18] sm:$0xff]  ;;  %v308_v59 = vld [vmem:[%s723_s4 + $0x10] sm:$0xff]  ;;  %v165_v62 = vld [vmem:[%s722_s3] sm:$0xff] }
   0x8   :  { %221 = vmatprep.subr.mxu0 %v168_v56  ;;  %338 = vmatprep.subr.mxu1 %v309_v57  ;;  %v306_v63 = vld [vmem:[%s723_s4] sm:$0xff] }
   0x9   :  { %222 = vmatpush1.msra.mxu0 %v167_v58  ;;  %339 = vmatpush1.msra.mxu1 %v308_v59 }
   0xa   :  { %223 = vmatprep.subr.mxu0 %v166_v60  ;;  %340 = vmatprep.subr.mxu1 %v307_v61 }
   0xb   :  { %43 = vadd.xlane.f32.xlu0 %v42_v10  ;;  %46 = vadd.xlane.f32.xlu1 %v45_v11 }
   0xc   :  { %224 = vmatpush1.msra.mxu0 %v165_v62  ;;  %341 = vmatpush1.msra.mxu1 %v306_v63 }
   0xf   :  { %49 = vadd.xlane.f32.xlu0 %v48_v14  ;;  %52 = vadd.xlane.f32.xlu1 %v51_v15 }
  0x8c   :  { %v32_v16 = vpop.xlane.xlu0 %31  ;;  %v38_v17 = vpop.xlane.xlu1 %37 }
  0x8d   :  { %v55_v18 = vmul.f32 0.0625, %v32_v16  ;;  %v57_v19 = vmul.f32 0.0625, %v38_v17 }
  0x8f   :  { %v598_v20 = vsub.f32 %v21_v0, %v55_v18  ;;  %v600_v21 = vsub.f32 %v23_v1, %v57_v19  ;;  %v532_v0 = vmov 0.0  }
  0x90   :  { %v35_v22 = vpop.xlane.xlu0 %34  ;;  %v41_v23 = vpop.xlane.xlu1 %40  ;;  %257 = vmatprep.mubr.f32.mxu0 %v532_v0  ;;  %374 = vmatprep.mubr.f32.mxu1 %v532_v0 }
  0x91   :  { %v56_v24 = vmul.f32 0.0625, %v35_v22  ;;  %v58_v25 = vmul.f32 0.0625, %v41_v23  ;;  %v71_v26 = vmul.f32 %v598_v20, %v598_v20  ;;  %v73_v27 = vmul.f32 %v600_v21, %v600_v21 }
  0x93   :  { %v606_v28 = vsub.f32 %v22_v2, %v56_v24  ;;  %v608_v29 = vsub.f32 %v24_v5, %v58_v25  ;;  %v79_v30 = vsel %vm29_vm0, %v71_v26, 0.0  ;;  %v85_v33 = vsel %vm29_vm0, %v73_v27, 0.0  ;;  %v472_v25 = vld [vmem:[%s720_s1] ss:$0 sm:$0xff]  ;;  %s533_s1 = smov [#allocation2]  }
  0x94   :  { %80 = vadd.xlane.f32.xlu0 %v79_v30  ;;  %v44_v31 = vpop.xlane.xlu0 %43  ;;  %v47_v32 = vpop.xlane.xlu1 %46 }
  0x95   :  { %v59_v34 = vmul.f32 0.0625, %v44_v31  ;;  %v60_v35 = vmul.f32 0.0625, %v47_v32  ;;  %v72_v36 = vmul.f32 %v606_v28, %v606_v28  ;;  %v74_v37 = vmul.f32 %v608_v29, %v608_v29  ;;  %v473_v31 = vld [vmem:[%s721_s2] ss:$0 sm:$0xff]  ;;  %s461_s2 = sshll.u32 %s533_s1, 4  ;;  %s462_s2 = int_to_ptr.vmem [resolvable:$true] %s461_s2 }
  0x96   :  { %s510_s26 = scalar_lea.vmem %s462_s2, 2048  ;;  %p515_p1 = scmp.lt.s32.totalorder %s462_s2, %s462_s2 }
  0x97   :  { %v616_v38 = vsub.f32 %v25_v8, %v59_v34  ;;  %v618_v39 = vsub.f32 %v26_v9, %v60_v35  ;;  %v82_v40 = vsel %vm29_vm0, %v72_v36, 0.0  ;;  %v88_v43 = vsel %vm29_vm0, %v74_v37, 0.0  ;;  %p511_p0 = scmp.ne.s32.totalorder %s462_s2, %s510_s26  ;;  %p516_p2 = scmp.lt.s32.totalorder %s510_s26, %s510_s26 }
  0x98   :  { %86 = vadd.xlane.f32.xlu0 %v85_v33  ;;  %83 = vadd.xlane.f32.xlu1 %v82_v40  ;;  %v50_v41 = vpop.xlane.xlu0 %49  ;;  %v53_v42 = vpop.xlane.xlu1 %52 }
  0x99   :  { %v61_v44 = vmul.f32 0.0625, %v50_v41  ;;  %v62_v45 = vmul.f32 0.0625, %v53_v42  ;;  %v75_v46 = vmul.f32 %v616_v38, %v616_v38  ;;  %v76_v47 = vmul.f32 %v618_v39, %v618_v39  ;;  %p517_p3 = por %p516_p2, %p515_p1 }
  0x9b   :  { %v626_v48 = vsub.f32 %v27_v12, %v61_v44  ;;  %v628_v49 = vsub.f32 %v28_v13, %v62_v45  ;;  %v91_v50 = vsel %vm29_vm0, %v75_v46, 0.0  ;;  %v94_v51 = vsel %vm29_vm0, %v76_v47, 0.0  ;;  %p518_p4 = pnand %p517_p3, %p511_p0 }
  0x9c   :  { %89 = vadd.xlane.f32.xlu1 %v88_v43  ;;  %92 = vadd.xlane.f32.xlu0 %v91_v50 }
  0x9d   :  { %v77_v52 = vmul.f32 %v626_v48, %v626_v48  ;;  %v78_v53 = vmul.f32 %v628_v49, %v628_v49 }
  0x9f   :  { %v97_v54 = vsel %vm29_vm0, %v77_v52, 0.0  ;;  %v100_v55 = vsel %vm29_vm0, %v78_v53, 0.0 }
  0xa0   :  { %95 = vadd.xlane.f32.xlu1 %v94_v51  ;;  %98 = vadd.xlane.f32.xlu0 %v97_v54 }
  0xa4   :  { %101 = vadd.xlane.f32.xlu1 %v100_v55 }
 0x11d   :  { %v81_v1 = vpop.xlane.xlu0 %80 }
 0x11e   :  { %v103_v2 = vmul.f32 0.0625, %v81_v1 }
 0x120   :  { %v111_v3 = vadd.f32 1e-05, %v103_v2 }
 0x121   :  { %v84_v4 = vpop.xlane.xlu1 %83  ;;  %v87_v5 = vpop.xlane.xlu0 %86 }
 0x122   :  { %494 = vrsqrt.f32 %v111_v3  ;;  %v104_v6 = vmul.f32 0.0625, %v84_v4  ;;  %v105_v7 = vmul.f32 0.0625, %v87_v5 }
 0x124   :  { %v112_v8 = vadd.f32 1e-05, %v104_v6  ;;  %v113_v9 = vadd.f32 1e-05, %v105_v7 }
 0x125   :  { %v90_v10 = vpop.xlane.xlu1 %89  ;;  %v93_v11 = vpop.xlane.xlu0 %92 }
 0x126   :  { %496 = vrsqrt.f32 %v112_v8  ;;  %v106_v12 = vmul.f32 0.0625, %v90_v10  ;;  %v107_v13 = vmul.f32 0.0625, %v93_v11 }
 0x127   :  { %498 = vrsqrt.f32 %v113_v9 }
 0x128   :  { %v114_v14 = vadd.f32 1e-05, %v106_v12  ;;  %v115_v15 = vadd.f32 1e-05, %v107_v13 }
 0x129   :  { %v96_v16 = vpop.xlane.xlu1 %95  ;;  %v99_v17 = vpop.xlane.xlu0 %98 }
 0x12a   :  { %500 = vrsqrt.f32 %v114_v14  ;;  %v108_v18 = vmul.f32 0.0625, %v96_v16  ;;  %v109_v22 = vmul.f32 0.0625, %v99_v17 }
 0x12b   :  { %502 = vrsqrt.f32 %v115_v15 }
 0x12c   :  { %v116_v19 = vadd.f32 1e-05, %v108_v18  ;;  %v117_v26 = vadd.f32 1e-05, %v109_v22 }
 0x12d   :  { %v102_v23 = vpop.xlane.xlu1 %101 }
 0x12e   :  { %504 = vrsqrt.f32 %v116_v19  ;;  %v110_v27 = vmul.f32 0.0625, %v102_v23 }
 0x12f   :  { %v495_v24 = vpop.eup %494  ;;  %506 = vrsqrt.f32 %v117_v26 }
 0x130   :  { %v127_v30 = vmul.f32 %v495_v24, %v598_v20  ;;  %v118_v35 = vadd.f32 1e-05, %v110_v27 }
 0x132   :  { %v142_v32 = vmul.f32 %v472_v25, %v127_v30  ;;  %508 = vrsqrt.f32 %v118_v35 }
 0x133   :  { %v497_v33 = vpop.eup %496 }
 0x134   :  { %v499_v34 = vpop.eup %498  ;;  %v157_v36 = vadd.f32 %v473_v31, %v142_v32  ;;  %v128_v37 = vmul.f32 %v497_v33, %v606_v28 }
 0x135   :  { %v129_v40 = vmul.f32 %v499_v34, %v600_v21 }
 0x136   :  { %474 = vmatmul.mubr.msk.f32.vlgmr.msra.gmra.mxu0 %vm29_vm0, %v157_v36  ;;  %482 = vmatmul.mubr.msk.f32.vlgmr.msra.gmra.mxu1 %vm29_vm0, %v157_v36  ;;  %v143_v41 = vmul.f32 %v472_v25, %v128_v37 }
 0x137   :  { %v501_v20 = vpop.eup %500  ;;  %263 = vmatprep.mubr.f32.mxu0 %v532_v0  ;;  %380 = vmatprep.mubr.f32.mxu1 %v532_v0  ;;  %v144_v43 = vmul.f32 %v472_v25, %v129_v40 }
 0x138   :  { %v158_v42 = vadd.f32 %v473_v31, %v143_v41  ;;  %v130_v44 = vmul.f32 %v501_v20, %v608_v29  ;;  %v503_v45 = vpop.eup %502 }
 0x139   :  { %v159_v21 = vadd.f32 %v473_v31, %v144_v43  ;;  %v131_v46 = vmul.f32 %v503_v45, %v616_v38 }
 0x13a   :  { %475 = vmatmul.mubr.msk.f32.gmra.mxu0 %vm29_vm0, %v158_v42  ;;  %483 = vmatmul.mubr.msk.f32.gmra.mxu1 %vm29_vm0, %v158_v42  ;;  %v145_v28 = vmul.f32 %v472_v25, %v130_v44 }
 0x13b   :  { %269 = vmatprep.mubr.f32.mxu0 %v532_v0  ;;  %386 = vmatprep.mubr.f32.mxu1 %v532_v0  ;;  %v505_v47 = vpop.eup %504  ;;  %v146_v50 = vmul.f32 %v472_v25, %v131_v46 }
 0x13c   :  { %v160_v29 = vadd.f32 %v473_v31, %v145_v28  ;;  %v132_v51 = vmul.f32 %v505_v47, %v618_v39  ;;  %v507_v52 = vpop.eup %506 }
 0x13d   :  { %v161_v38 = vadd.f32 %v473_v31, %v146_v50  ;;  %v133_v54 = vmul.f32 %v507_v52, %v626_v48 }
 0x13e   :  { %476 = vmatmul.mubr.msk.f32.gmra.mxu0 %vm29_vm0, %v159_v21  ;;  %484 = vmatmul.mubr.msk.f32.gmra.mxu1 %vm29_vm0, %v159_v21  ;;  %v147_v53 = vmul.f32 %v472_v25, %v132_v51 }
 0x13f   :  { %275 = vmatprep.mubr.f32.mxu0 %v532_v0  ;;  %392 = vmatprep.mubr.f32.mxu1 %v532_v0  ;;  %v509_v55 = vpop.eup %508  ;;  %v148_v56 = vmul.f32 %v472_v25, %v133_v54 }
 0x140   :  { %v162_v39 = vadd.f32 %v473_v31, %v147_v53  ;;  %v134_v57 = vmul.f32 %v509_v55, %v628_v49 }
 0x141   :  { %v163_v48 = vadd.f32 %v473_v31, %v148_v56 }
 0x142   :  { %477 = vmatmul.mubr.msk.f32.gmra.mxu0 %vm29_vm0, %v160_v29  ;;  %485 = vmatmul.mubr.msk.f32.gmra.mxu1 %vm29_vm0, %v160_v29  ;;  %v149_v58 = vmul.f32 %v472_v25, %v134_v57 }
 0x143   :  { %281 = vmatprep.mubr.f32.mxu0 %v532_v0  ;;  %398 = vmatprep.mubr.f32.mxu1 %v532_v0 }
 0x144   :  { %v164_v59 = vadd.f32 %v473_v31, %v149_v58 }
 0x146   :  { %478 = vmatmul.mubr.msk.f32.gmra.mxu0 %vm29_vm0, %v161_v38  ;;  %486 = vmatmul.mubr.msk.f32.gmra.mxu1 %vm29_vm0, %v161_v38 }
 0x147   :  { %287 = vmatprep.mubr.f32.mxu0 %v532_v0  ;;  %404 = vmatprep.mubr.f32.mxu1 %v532_v0 }
 0x14a   :  { %479 = vmatmul.mubr.msk.f32.gmra.mxu0 %vm29_vm0, %v162_v39  ;;  %487 = vmatmul.mubr.msk.f32.gmra.mxu1 %vm29_vm0, %v162_v39 }
 0x14b   :  { %293 = vmatprep.mubr.f32.mxu0 %v532_v0  ;;  %410 = vmatprep.mubr.f32.mxu1 %v532_v0 }
 0x14e   :  { %480 = vmatmul.mubr.msk.f32.gmra.mxu0 %vm29_vm0, %v163_v48  ;;  %488 = vmatmul.mubr.msk.f32.gmra.mxu1 %vm29_vm0, %v163_v48 }
 0x14f   :  { %299 = vmatprep.mubr.f32.mxu0 %v532_v0  ;;  %416 = vmatprep.mubr.f32.mxu1 %v532_v0 }
 0x152   :  { %481 = vmatmul.mubr.msk.f32.gmra.mxu0 %vm29_vm0, %v164_v59  ;;  %489 = vmatmul.mubr.msk.f32.gmra.mxu1 %vm29_vm0, %v164_v59 }
 0x1f6   :  { %v259_v49 = vpop.f32.mrf.mxu0  ;;  %v376_v60 = vpop.f32.mrf.mxu1 }
 0x1f7   :  { %v423_v61 = vmul.f32 %v376_v60, %v259_v49 }
 0x1f8   :  { %v261_v62 = vpop.f32.mrf.mxu0  ;;  %v378_v63 = vpop.f32.mrf.mxu1 }
 0x1f9   :  { %439 = vst [vmem:[#allocation2] sm:$0xff] %v423_v61  ;;  %v424_v1 = vmul.f32 %v378_v63, %v261_v62 }
 0x1fa   :  { %v265_v2 = vpop.f32.mrf.mxu0  ;;  %v382_v3 = vpop.f32.mrf.mxu1 }
 0x1fb   :  { %441 = vst.msk [vmem:[#allocation2 + $0x8] sm:$0xff] %vm440_vm1, %v424_v1  ;;  %v425_v4 = vmul.f32 %v382_v3, %v265_v2 }
 0x1fc   :  { %v267_v5 = vpop.f32.mrf.mxu0  ;;  %v384_v0 = vpop.f32.mrf.mxu1 }
 0x1fd   :  { %442 = vst [vmem:[#allocation2 + $0x10] sm:$0xff] %v425_v4  ;;  %v426_v6 = vmul.f32 %v384_v0, %v267_v5 }
 0x1fe   :  { %v271_v7 = vpop.f32.mrf.mxu0  ;;  %v388_v8 = vpop.f32.mrf.mxu1 }
 0x1ff   :  { %443 = vst.msk [vmem:[#allocation2 + $0x18] sm:$0xff] %vm440_vm1, %v426_v6  ;;  %v427_v9 = vmul.f32 %v388_v8, %v271_v7 }
 0x200   :  { %v273_v10 = vpop.f32.mrf.mxu0  ;;  %v390_v11 = vpop.f32.mrf.mxu1 }
 0x201   :  { %444 = vst [vmem:[#allocation2 + $0x20] sm:$0xff] %v427_v9  ;;  %v428_v12 = vmul.f32 %v390_v11, %v273_v10 }
 0x202   :  { %v277_v13 = vpop.f32.mrf.mxu0  ;;  %v394_v14 = vpop.f32.mrf.mxu1 }
 0x203   :  { %445 = vst.msk [vmem:[#allocation2 + $0x28] sm:$0xff] %vm440_vm1, %v428_v12  ;;  %v429_v15 = vmul.f32 %v394_v14, %v277_v13 }
 0x204   :  { %v279_v16 = vpop.f32.mrf.mxu0  ;;  %v396_v17 = vpop.f32.mrf.mxu1 }
 0x205   :  { %446 = vst [vmem:[#allocation2 + $0x30] sm:$0xff] %v429_v15  ;;  %v430_v18 = vmul.f32 %v396_v17, %v279_v16 }
 0x206   :  { %v283_v19 = vpop.f32.mrf.mxu0  ;;  %v400_v22 = vpop.f32.mrf.mxu1 }
 0x207   :  { %447 = vst.msk [vmem:[#allocation2 + $0x38] sm:$0xff] %vm440_vm1, %v430_v18  ;;  %v431_v23 = vmul.f32 %v400_v22, %v283_v19 }
 0x208   :  { %v285_v24 = vpop.f32.mrf.mxu0  ;;  %v402_v25 = vpop.f32.mrf.mxu1 }
 0x209   :  { %448 = vst [vmem:[#allocation2 + $0x40] sm:$0xff] %v431_v23  ;;  %v432_v26 = vmul.f32 %v402_v25, %v285_v24 }
 0x20a   :  { %v289_v27 = vpop.f32.mrf.mxu0  ;;  %v406_v30 = vpop.f32.mrf.mxu1 }
 0x20b   :  { %449 = vst.msk [vmem:[#allocation2 + $0x48] sm:$0xff] %vm440_vm1, %v432_v26  ;;  %v433_v31 = vmul.f32 %v406_v30, %v289_v27 }
 0x20c   :  { %v291_v32 = vpop.f32.mrf.mxu0  ;;  %v408_v33 = vpop.f32.mrf.mxu1 }
 0x20d   :  { %450 = vst [vmem:[#allocation2 + $0x50] sm:$0xff] %v433_v31  ;;  %v434_v34 = vmul.f32 %v408_v33, %v291_v32 }
 0x20e   :  { %v295_v35 = vpop.f32.mrf.mxu0  ;;  %v412_v36 = vpop.f32.mrf.mxu1 }
 0x20f   :  { %451 = vst.msk [vmem:[#allocation2 + $0x58] sm:$0xff] %vm440_vm1, %v434_v34  ;;  %v435_v37 = vmul.f32 %v412_v36, %v295_v35 }
 0x210   :  { %v297_v40 = vpop.f32.mrf.mxu0  ;;  %v414_v41 = vpop.f32.mrf.mxu1 }
 0x211   :  { %452 = vst [vmem:[#allocation2 + $0x60] sm:$0xff] %v435_v37  ;;  %v436_v20 = vmul.f32 %v414_v41, %v297_v40 }
 0x212   :  { %v301_v42 = vpop.f32.mrf.mxu0  ;;  %v418_v43 = vpop.f32.mrf.mxu1 }
 0x213   :  { %453 = vst.msk [vmem:[#allocation2 + $0x68] sm:$0xff] %vm440_vm1, %v436_v20  ;;  %v437_v44 = vmul.f32 %v418_v43, %v301_v42 }
 0x214   :  { %v303_v45 = vpop.f32.mrf.mxu0  ;;  %v420_v21 = vpop.f32.mrf.mxu1 }
 0x215   :  { %454 = vst [vmem:[#allocation2 + $0x70] sm:$0xff] %v437_v44  ;;  %v438_v28 = vmul.f32 %v420_v21, %v303_v45 }
 0x217   :  { %455 = vst.msk [vmem:[#allocation2 + $0x78] sm:$0xff] %vm440_vm1, %v438_v28 }
 0x218   :  { %521 = shalt.err (!%p518_p4)
}
 0x219   :  { %s534_s27 = smov 256   ;;  %s535_s28 = smov 16  }
 0x21a   :  { %467 = dma.vmem_to_hbm [thread:$0]  %s462_s2, 2048, %s724_s5, [#allocation3], %s534_s27, %s534_s27, %s535_s28  }
 0x21b   :  { %530 = dma.done.wait [#allocation3], 2048  }
 0x21c   :  { %531 = vsyncadd [#allocation3], 4294965248 }
 0x21d   :  { %471 = vsyncpa [#allocation3], 1 }

// kernel: tpu_custom_call.1
= control target key start
LH: loop header
LB: loop body
LE: loop exit
PB: predicated region body
PF: predicated region fallthrough
CT: control target
= control target key end

     0   :  { %vm29_vm0 = vcmask 130048   ;;  %s719_s0 = inlined_call_operand.vmem [shape: f32[64,16], index: 0, kind: input, shape index: {}]   ;;  %s720_s1 = inlined_call_operand.vmem [shape: f32[1,16], index: 1, kind: input, shape index: {}]   ;;  %s721_s2 = inlined_call_operand.vmem [shape: f32[1,16], index: 2, kind: input, shape index: {}]   ;;  %s722_s3 = inlined_call_operand.vmem [shape: f32[16,136], index: 3, kind: input, shape index: {}]   ;;  %s723_s4 = inlined_call_operand.vmem [shape: f32[16,136], index: 4, kind: input, shape index: {}]   ;;  %s724_s5 = inlined_call_operand.hbm [shape: f32[64,136], index: 5, kind: output, shape index: {}]  }
   0x1   :  { %v21_v0 = vld [vmem:[%s719_s0] sm:$0xff]  ;;  %v23_v1 = vld [vmem:[%s719_s0 + $0x10] sm:$0xff]  ;;  %v22_v2 = vld [vmem:[%s719_s0 + $0x8] sm:$0xff] }
   0x2   :  { %v30_v3 = vsel %vm29_vm0, %v21_v0, 0.0  ;;  %v36_v4 = vsel %vm29_vm0, %v23_v1, 0.0  ;;  %v24_v5 = vld [vmem:[%s719_s0 + $0x18] sm:$0xff]  ;;  %v33_v6 = vsel %vm29_vm0, %v22_v2, 0.0 }
   0x3   :  { %31 = vadd.xlane.f32.xlu0 %v30_v3  ;;  %37 = vadd.xlane.f32.xlu1 %v36_v4  ;;  %v39_v7 = vsel %vm29_vm0, %v24_v5, 0.0 }
   0x4   :  { %10 = vsyncpa [#allocation3], 0  ;;  %v25_v8 = vld [vmem:[%s719_s0 + $0x20] sm:$0xff]  ;;  %v26_v9 = vld [vmem:[%s719_s0 + $0x28] sm:$0xff]  ;;  %vm440_vm1 = vcmask 64512  }
   0x5   :  { %v42_v10 = vsel %vm29_vm0, %v25_v8, 0.0  ;;  %v45_v11 = vsel %vm29_vm0, %v26_v9, 0.0  ;;  %v27_v12 = vld [vmem:[%s719_s0 + $0x30] sm:$0xff]  ;;  %v28_v13 = vld [vmem:[%s719_s0 + $0x38] sm:$0xff]  ;;  %v166_v60 = vld [vmem:[%s722_s3 + $0x8] sm:$0xff] }
   0x6   :  { %v48_v14 = vsel %vm29_vm0, %v27_v12, 0.0  ;;  %v51_v15 = vsel %vm29_vm0, %v28_v13, 0.0  ;;  %v168_v56 = vld [vmem:[%s722_s3 + $0x18] sm:$0xff]  ;;  %v167_v58 = vld [vmem:[%s722_s3 + $0x10] sm:$0xff]  ;;  %v307_v61 = vld [vmem:[%s723_s4 + $0x8] sm:$0xff] }
   0x7   :  { %34 = vadd.xlane.f32.xlu0 %v33_v6  ;;  %40 = vadd.xlane.f32.xlu1 %v39_v7  ;;  %v309_v57 = vld [vmem:[%s723_s4 + $0x18] sm:$0xff]  ;;  %v308_v59 = vld [vmem:[%s723_s4 + $0x10] sm:$0xff]  ;;  %v165_v62 = vld [vmem:[%s722_s3] sm:$0xff] }
   0x8   :  { %221 = vmatprep.subr.mxu0 %v168_v56  ;;  %338 = vmatprep.subr.mxu1 %v309_v57  ;;  %v306_v63 = vld [vmem:[%s723_s4] sm:$0xff] }
   0x9   :  { %222 = vmatpush1.msra.mxu0 %v167_v58  ;;  %339 = vmatpush1.msra.mxu1 %v308_v59 }
   0xa   :  { %223 = vmatprep.subr.mxu0 %v166_v60  ;;  %340 = vmatprep.subr.mxu1 %v307_v61 }
   0xb   :  { %43 = vadd.xlane.f32.xlu0 %v42_v10  ;;  %46 = vadd.xlane.f32.xlu1 %v45_v11 }
   0xc   :  { %224 = vmatpush1.msra.mxu0 %v165_v62  ;;  %341 = vmatpush1.msra.mxu1 %v306_v63 }
   0xf   :  { %49 = vadd.xlane.f32.xlu0 %v48_v14  ;;  %52 = vadd.xlane.f32.xlu1 %v51_v15 }
  0x8c   :  { %v32_v16 = vpop.xlane.xlu0 %31  ;;  %v38_v17 = vpop.xlane.xlu1 %37 }
  0x8d   :  { %v55_v18 = vmul.f32 0.0625, %v32_v16  ;;  %v57_v19 = vmul.f32 0.0625, %v38_v17 }
  0x8f   :  { %v598_v20 = vsub.f32 %v21_v0, %v55_v18  ;;  %v600_v21 = vsub.f32 %v23_v1, %v57_v19  ;;  %v532_v0 = vmov 0.0  }
  0x90   :  { %v35_v22 = vpop.xlane.xlu0 %34  ;;  %v41_v23 = vpop.xlane.xlu1 %40  ;;  %257 = vmatprep.mubr.f32.mxu0 %v532_v0  ;;  %374 = vmatprep.mubr.f32.mxu1 %v532_v0 }
  0x91   :  { %v56_v24 = vmul.f32 0.0625, %v35_v22  ;;  %v58_v25 = vmul.f32 0.0625, %v41_v23  ;;  %v71_v26 = vmul.f32 %v598_v20, %v598_v20  ;;  %v73_v27 = vmul.f32 %v600_v21, %v600_v21 }
  0x93   :  { %v606_v28 = vsub.f32 %v22_v2, %v56_v24  ;;  %v608_v29 = vsub.f32 %v24_v5, %v58_v25  ;;  %v79_v30 = vsel %vm29_vm0, %v71_v26, 0.0  ;;  %v85_v33 = vsel %vm29_vm0, %v73_v27, 0.0  ;;  %v472_v25 = vld [vmem:[%s720_s1] ss:$0 sm:$0xff]  ;;  %s533_s1 = smov [#allocation2]  }
  0x94   :  { %80 = vadd.xlane.f32.xlu0 %v79_v30  ;;  %v44_v31 = vpop.xlane.xlu0 %43  ;;  %v47_v32 = vpop.xlane.xlu1 %46 }
  0x95   :  { %v59_v34 = vmul.f32 0.0625, %v44_v31  ;;  %v60_v35 = vmul.f32 0.0625, %v47_v32  ;;  %v72_v36 = vmul.f32 %v606_v28, %v606_v28  ;;  %v74_v37 = vmul.f32 %v608_v29, %v608_v29  ;;  %v473_v31 = vld [vmem:[%s721_s2] ss:$0 sm:$0xff]  ;;  %s461_s2 = sshll.u32 %s533_s1, 4  ;;  %s462_s2 = int_to_ptr.vmem [resolvable:$true] %s461_s2 }
  0x96   :  { %s510_s26 = scalar_lea.vmem %s462_s2, 2048  ;;  %p515_p1 = scmp.lt.s32.totalorder %s462_s2, %s462_s2 }
  0x97   :  { %v616_v38 = vsub.f32 %v25_v8, %v59_v34  ;;  %v618_v39 = vsub.f32 %v26_v9, %v60_v35  ;;  %v82_v40 = vsel %vm29_vm0, %v72_v36, 0.0  ;;  %v88_v43 = vsel %vm29_vm0, %v74_v37, 0.0  ;;  %p511_p0 = scmp.ne.s32.totalorder %s462_s2, %s510_s26  ;;  %p516_p2 = scmp.lt.s32.totalorder %s510_s26, %s510_s26 }
  0x98   :  { %86 = vadd.xlane.f32.xlu0 %v85_v33  ;;  %83 = vadd.xlane.f32.xlu1 %v82_v40  ;;  %v50_v41 = vpop.xlane.xlu0 %49  ;;  %v53_v42 = vpop.xlane.xlu1 %52 }
  0x99   :  { %v61_v44 = vmul.f32 0.0625, %v50_v41  ;;  %v62_v45 = vmul.f32 0.0625, %v53_v42  ;;  %v75_v46 = vmul.f32 %v616_v38, %v616_v38  ;;  %v76_v47 = vmul.f32 %v618_v39, %v618_v39  ;;  %p517_p3 = por %p516_p2, %p515_p1 }
  0x9b   :  { %v626_v48 = vsub.f32 %v27_v12, %v61_v44  ;;  %v628_v49 = vsub.f32 %v28_v13, %v62_v45  ;;  %v91_v50 = vsel %vm29_vm0, %v75_v46, 0.0  ;;  %v94_v51 = vsel %vm29_vm0, %v76_v47, 0.0  ;;  %p518_p4 = pnand %p517_p3, %p511_p0 }
  0x9c   :  { %89 = vadd.xlane.f32.xlu1 %v88_v43  ;;  %92 = vadd.xlane.f32.xlu0 %v91_v50 }
  0x9d   :  { %v77_v52 = vmul.f32 %v626_v48, %v626_v48  ;;  %v78_v53 = vmul.f32 %v628_v49, %v628_v49 }
  0x9f   :  { %v97_v54 = vsel %vm29_vm0, %v77_v52, 0.0  ;;  %v100_v55 = vsel %vm29_vm0, %v78_v53, 0.0 }
  0xa0   :  { %95 = vadd.xlane.f32.xlu1 %v94_v51  ;;  %98 = vadd.xlane.f32.xlu0 %v97_v54 }
  0xa4   :  { %101 = vadd.xlane.f32.xlu1 %v100_v55 }
 0x11d   :  { %v81_v1 = vpop.xlane.xlu0 %80 }
 0x11e   :  { %v103_v2 = vmul.f32 0.0625, %v81_v1 }
 0x120   :  { %v111_v3 = vadd.f32 1e-05, %v103_v2 }
 0x121   :  { %v84_v4 = vpop.xlane.xlu1 %83  ;;  %v87_v5 = vpop.xlane.xlu0 %86 }
 0x122   :  { %494 = vrsqrt.f32 %v111_v3  ;;  %v104_v6 = vmul.f32 0.0625, %v84_v4  ;;  %v105_v7 = vmul.f32 0.0625, %v87_v5 }
 0x124   :  { %v112_v8 = vadd.f32 1e-05, %v104_v6  ;;  %v113_v9 = vadd.f32 1e-05, %v105_v7 }
 0x125   :  { %v90_v10 = vpop.xlane.xlu1 %89  ;;  %v93_v11 = vpop.xlane.xlu0 %92 }
 0x126   :  { %496 = vrsqrt.f32 %v112_v8  ;;  %v106_v12 = vmul.f32 0.0625, %v90_v10  ;;  %v107_v13 = vmul.f32 0.0625, %v93_v11 }
 0x127   :  { %498 = vrsqrt.f32 %v113_v9 }
 0x128   :  { %v114_v14 = vadd.f32 1e-05, %v106_v12  ;;  %v115_v15 = vadd.f32 1e-05, %v107_v13 }
 0x129   :  { %v96_v16 = vpop.xlane.xlu1 %95  ;;  %v99_v17 = vpop.xlane.xlu0 %98 }
 0x12a   :  { %500 = vrsqrt.f32 %v114_v14  ;;  %v108_v18 = vmul.f32 0.0625, %v96_v16  ;;  %v109_v22 = vmul.f32 0.0625, %v99_v17 }
 0x12b   :  { %502 = vrsqrt.f32 %v115_v15 }
 0x12c   :  { %v116_v19 = vadd.f32 1e-05, %v108_v18  ;;  %v117_v26 = vadd.f32 1e-05, %v109_v22 }
 0x12d   :  { %v102_v23 = vpop.xlane.xlu1 %101 }
 0x12e   :  { %504 = vrsqrt.f32 %v116_v19  ;;  %v110_v27 = vmul.f32 0.0625, %v102_v23 }
 0x12f   :  { %v495_v24 = vpop.eup %494  ;;  %506 = vrsqrt.f32 %v117_v26 }
 0x130   :  { %v127_v30 = vmul.f32 %v495_v24, %v598_v20  ;;  %v118_v35 = vadd.f32 1e-05, %v110_v27 }
 0x132   :  { %v142_v32 = vmul.f32 %v472_v25, %v127_v30  ;;  %508 = vrsqrt.f32 %v118_v35 }
 0x133   :  { %v497_v33 = vpop.eup %496 }
 0x134   :  { %v499_v34 = vpop.eup %498  ;;  %v157_v36 = vadd.f32 %v473_v31, %v142_v32  ;;  %v128_v37 = vmul.f32 %v497_v33, %v606_v28 }
 0x135   :  { %v129_v40 = vmul.f32 %v499_v34, %v600_v21 }
 0x136   :  { %474 = vmatmul.mubr.msk.f32.vlgmr.msra.gmra.mxu0 %vm29_vm0, %v157_v36  ;;  %482 = vmatmul.mubr.msk.f32.vlgmr.msra.gmra.mxu1 %vm29_vm0, %v157_v36  ;;  %v143_v41 = vmul.f32 %v472_v25, %v128_v37 }
 0x137   :  { %v501_v20 = vpop.eup %500  ;;  %263 = vmatprep.mubr.f32.mxu0 %v532_v0  ;;  %380 = vmatprep.mubr.f32.mxu1 %v532_v0  ;;  %v144_v43 = vmul.f32 %v472_v25, %v129_v40 }
 0x138   :  { %v158_v42 = vadd.f32 %v473_v31, %v143_v41  ;;  %v130_v44 = vmul.f32 %v501_v20, %v608_v29  ;;  %v503_v45 = vpop.eup %502 }
 0x139   :  { %v159_v21 = vadd.f32 %v473_v31, %v144_v43  ;;  %v131_v46 = vmul.f32 %v503_v45, %v616_v38 }
 0x13a   :  { %475 = vmatmul.mubr.msk.f32.gmra.mxu0 %vm29_vm0, %v158_v42  ;;  %483 = vmatmul.mubr.msk.f32.gmra.mxu1 %vm29_vm0, %v158_v42  ;;  %v145_v28 = vmul.f32 %v472_v25, %v130_v44 }
 0x13b   :  { %269 = vmatprep.mubr.f32.mxu0 %v532_v0  ;;  %386 = vmatprep.mubr.f32.mxu1 %v532_v0  ;;  %v505_v47 = vpop.eup %504  ;;  %v146_v50 = vmul.f32 %v472_v25, %v131_v46 }
 0x13c   :  { %v160_v29 = vadd.f32 %v473_v31, %v145_v28  ;;  %v132_v51 = vmul.f32 %v505_v47, %v618_v39  ;;  %v507_v52 = vpop.eup %506 }
 0x13d   :  { %v161_v38 = vadd.f32 %v473_v31, %v146_v50  ;;  %v133_v54 = vmul.f32 %v507_v52, %v626_v48 }
 0x13e   :  { %476 = vmatmul.mubr.msk.f32.gmra.mxu0 %vm29_vm0, %v159_v21  ;;  %484 = vmatmul.mubr.msk.f32.gmra.mxu1 %vm29_vm0, %v159_v21  ;;  %v147_v53 = vmul.f32 %v472_v25, %v132_v51 }
 0x13f   :  { %275 = vmatprep.mubr.f32.mxu0 %v532_v0  ;;  %392 = vmatprep.mubr.f32.mxu1 %v532_v0  ;;  %v509_v55 = vpop.eup %508  ;;  %v148_v56 = vmul.f32 %v472_v25, %v133_v54 }
 0x140   :  { %v162_v39 = vadd.f32 %v473_v31, %v147_v53  ;;  %v134_v57 = vmul.f32 %v509_v55, %v628_v49 }
 0x141   :  { %v163_v48 = vadd.f32 %v473_v31, %v148_v56 }
 0x142   :  { %477 = vmatmul.mubr.msk.f32.gmra.mxu0 %vm29_vm0, %v160_v29  ;;  %485 = vmatmul.mubr.msk.f32.gmra.mxu1 %vm29_vm0, %v160_v29  ;;  %v149_v58 = vmul.f32 %v472_v25, %v134_v57 }
 0x143   :  { %281 = vmatprep.mubr.f32.mxu0 %v532_v0  ;;  %398 = vmatprep.mubr.f32.mxu1 %v532_v0 }
 0x144   :  { %v164_v59 = vadd.f32 %v473_v31, %v149_v58 }
 0x146   :  { %478 = vmatmul.mubr.msk.f32.gmra.mxu0 %vm29_vm0, %v161_v38  ;;  %486 = vmatmul.mubr.msk.f32.gmra.mxu1 %vm29_vm0, %v161_v38 }
 0x147   :  { %287 = vmatprep.mubr.f32.mxu0 %v532_v0  ;;  %404 = vmatprep.mubr.f32.mxu1 %v532_v0 }
 0x14a   :  { %479 = vmatmul.mubr.msk.f32.gmra.mxu0 %vm29_vm0, %v162_v39  ;;  %487 = vmatmul.mubr.msk.f32.gmra.mxu1 %vm29_vm0, %v162_v39 }
 0x14b   :  { %293 = vmatprep.mubr.f32.mxu0 %v532_v0  ;;  %410 = vmatprep.mubr.f32.mxu1 %v532_v0 }
 0x14e   :  { %480 = vmatmul.mubr.msk.f32.gmra.mxu0 %vm29_vm0, %v163_v48  ;;  %488 = vmatmul.mubr.msk.f32.gmra.mxu1 %vm29_vm0, %v163_v48 }
 0x14f   :  { %299 = vmatprep.mubr.f32.mxu0 %v532_v0  ;;  %416 = vmatprep.mubr.f32.mxu1 %v532_v0 }
 0x152   :  { %481 = vmatmul.mubr.msk.f32.gmra.mxu0 %vm29_vm0, %v164_v59  ;;  %489 = vmatmul.mubr.msk.f32.gmra.mxu1 %vm29_vm0, %v164_v59 }
 0x1f6   :  { %v259_v49 = vpop.f32.mrf.mxu0  ;;  %v376_v60 = vpop.f32.mrf.mxu1 }
 0x1f7   :  { %v423_v61 = vmul.f32 %v376_v60, %v259_v49 }
 0x1f8   :  { %v261_v62 = vpop.f32.mrf.mxu0  ;;  %v378_v63 = vpop.f32.mrf.mxu1 }
 0x1f9   :  { %439 = vst [vmem:[#allocation2] sm:$0xff] %v423_v61  ;;  %v424_v1 = vmul.f32 %v378_v63, %v261_v62 }
 0x1fa   :  { %v265_v2 = vpop.f32.mrf.mxu0  ;;  %v382_v3 = vpop.f32.mrf.mxu1 }
 0x1fb   :  { %441 = vst.msk [vmem:[#allocation2 + $0x8] sm:$0xff] %vm440_vm1, %v424_v1  ;;  %v425_v4 = vmul.f32 %v382_v3, %v265_v2 }
 0x1fc   :  { %v267_v5 = vpop.f32.mrf.mxu0  ;;  %v384_v0 = vpop.f32.mrf.mxu1 }
 0x1fd   :  { %442 = vst [vmem:[#allocation2 + $0x10] sm:$0xff] %v425_v4  ;;  %v426_v6 = vmul.f32 %v384_v0, %v267_v5 }
 0x1fe   :  { %v271_v7 = vpop.f32.mrf.mxu0  ;;  %v388_v8 = vpop.f32.mrf.mxu1 }
 0x1ff   :  { %443 = vst.msk [vmem:[#allocation2 + $0x18] sm:$0xff] %vm440_vm1, %v426_v6  ;;  %v427_v9 = vmul.f32 %v388_v8, %v271_v7 }
 0x200   :  { %v273_v10 = vpop.f32.mrf.mxu0  ;;  %v390_v11 = vpop.f32.mrf.mxu1 }
 0x201   :  { %444 = vst [vmem:[#allocation2 + $0x20] sm:$0xff] %v427_v9  ;;  %v428_v12 = vmul.f32 %v390_v11, %v273_v10 }
 0x202   :  { %v277_v13 = vpop.f32.mrf.mxu0  ;;  %v394_v14 = vpop.f32.mrf.mxu1 }
 0x203   :  { %445 = vst.msk [vmem:[#allocation2 + $0x28] sm:$0xff] %vm440_vm1, %v428_v12  ;;  %v429_v15 = vmul.f32 %v394_v14, %v277_v13 }
 0x204   :  { %v279_v16 = vpop.f32.mrf.mxu0  ;;  %v396_v17 = vpop.f32.mrf.mxu1 }
 0x205   :  { %446 = vst [vmem:[#allocation2 + $0x30] sm:$0xff] %v429_v15  ;;  %v430_v18 = vmul.f32 %v396_v17, %v279_v16 }
 0x206   :  { %v283_v19 = vpop.f32.mrf.mxu0  ;;  %v400_v22 = vpop.f32.mrf.mxu1 }
 0x207   :  { %447 = vst.msk [vmem:[#allocation2 + $0x38] sm:$0xff] %vm440_vm1, %v430_v18  ;;  %v431_v23 = vmul.f32 %v400_v22, %v283_v19 }
 0x208   :  { %v285_v24 = vpop.f32.mrf.mxu0  ;;  %v402_v25 = vpop.f32.mrf.mxu1 }
 0x209   :  { %448 = vst [vmem:[#allocation2 + $0x40] sm:$0xff] %v431_v23  ;;  %v432_v26 = vmul.f32 %v402_v25, %v285_v24 }
 0x20a   :  { %v289_v27 = vpop.f32.mrf.mxu0  ;;  %v406_v30 = vpop.f32.mrf.mxu1 }
 0x20b   :  { %449 = vst.msk [vmem:[#allocation2 + $0x48] sm:$0xff] %vm440_vm1, %v432_v26  ;;  %v433_v31 = vmul.f32 %v406_v30, %v289_v27 }
 0x20c   :  { %v291_v32 = vpop.f32.mrf.mxu0  ;;  %v408_v33 = vpop.f32.mrf.mxu1 }
 0x20d   :  { %450 = vst [vmem:[#allocation2 + $0x50] sm:$0xff] %v433_v31  ;;  %v434_v34 = vmul.f32 %v408_v33, %v291_v32 }
 0x20e   :  { %v295_v35 = vpop.f32.mrf.mxu0  ;;  %v412_v36 = vpop.f32.mrf.mxu1 }
 0x20f   :  { %451 = vst.msk [vmem:[#allocation2 + $0x58] sm:$0xff] %vm440_vm1, %v434_v34  ;;  %v435_v37 = vmul.f32 %v412_v36, %v295_v35 }
 0x210   :  { %v297_v40 = vpop.f32.mrf.mxu0  ;;  %v414_v41 = vpop.f32.mrf.mxu1 }
 0x211   :  { %452 = vst [vmem:[#allocation2 + $0x60] sm:$0xff] %v435_v37  ;;  %v436_v20 = vmul.f32 %v414_v41, %v297_v40 }
 0x212   :  { %v301_v42 = vpop.f32.mrf.mxu0  ;;  %v418_v43 = vpop.f32.mrf.mxu1 }
 0x213   :  { %453 = vst.msk [vmem:[#allocation2 + $0x68] sm:$0xff] %vm440_vm1, %v436_v20  ;;  %v437_v44 = vmul.f32 %v418_v43, %v301_v42 }
 0x214   :  { %v303_v45 = vpop.f32.mrf.mxu0  ;;  %v420_v21 = vpop.f32.mrf.mxu1 }
 0x215   :  { %454 = vst [vmem:[#allocation2 + $0x70] sm:$0xff] %v437_v44  ;;  %v438_v28 = vmul.f32 %v420_v21, %v303_v45 }
 0x217   :  { %455 = vst.msk [vmem:[#allocation2 + $0x78] sm:$0xff] %vm440_vm1, %v438_v28 }
 0x218   :  { %521 = shalt.err (!%p518_p4)
}
 0x219   :  { %s534_s27 = smov 256   ;;  %s535_s28 = smov 16  }
 0x21a   :  { %467 = dma.vmem_to_hbm [thread:$0]  %s462_s2, 2048, %s724_s5, [#allocation3], %s534_s27, %s534_s27, %s535_s28  }
 0x21b   :  { %530 = dma.done.wait [#allocation3], 2048  }
 0x21c   :  { %531 = vsyncadd [#allocation3], 4294965248 }
 0x21d   :  { %471 = vsyncpa [#allocation3], 1 }

</bundles_post_ra>
